<compile_context>
chip_gen: v7x
topology: tpu7x:2x2x1
jax: 0.10.0
libtpu: 0.0.40
codegen_flags: <defaults>
</compile_context>

<pallas_src>
import functools

import jax
import jax.numpy as jnp
from jax import lax
from jax.experimental import pallas as pl
from jax.experimental.pallas import tpu as pltpu


def _tv_kernel(x_ref, wts_ref, out_ref, *, img_w, rows_total, tile_rows,
               ragged_rows):
    # x block: (TR, L) in the input dtype (L = H*W, full extent).
    x = x_ref[...]
    l = x.shape[-1]

    # Resident per-lane weights: 1/count_w (resp. 1/count_h) on valid lanes,
    # 0 on masked lanes.  Shape (1, L), broadcast into the multiplies below.
    ww = wts_ref[0:1, :]
    wh = wts_ref[1:2, :]

    # Horizontal neighbour x[p+1] and vertical neighbour x[p+W] via lane
    # rotations (XLU slot).  Diff in the input dtype, square/accumulate in f32.
    dw = (pltpu.roll(x, shift=l - 1, axis=1) - x).astype(jnp.float32)
    dh = (pltpu.roll(x, shift=l - img_w, axis=1) - x).astype(jnp.float32)

    contrib = dw * dw * ww + dh * dh * wh            # (TR, L) f32
    row_sums = jnp.sum(contrib, axis=1, keepdims=True)  # (TR, 1)

    if ragged_rows:
        # Only the last (partial) tile has garbage rows; the mask is applied on
        # the (TR,1) per-row partials, so its per-element cost is negligible.
        row_idx = (pl.program_id(0) * tile_rows
                   + lax.broadcasted_iota(jnp.int32, row_sums.shape, 0))
        row_sums = jnp.where(row_idx < rows_total, row_sums, 0.0)

    total = jnp.sum(row_sums)
    # Dense, unmasked (8,128) store of the per-tile partial.
    out_ref[0] = jnp.full(out_ref.shape[1:], total, dtype=jnp.float32)


def l_ill_loss(x, *, tile_bytes=None, vmem_limit_bytes=None):
    """Pallas implementation of L_ill.forward for NCHW input x."""
    b, c, h, w = x.shape
    count_h = (h - 1) * w
    count_w = h * (w - 1)

    r = b * c
    row_len = h * w
    x2 = x.reshape(r, row_len)          # metadata-only reshape, no HBM copy
    dsize = jnp.dtype(x2.dtype).itemsize

    # Chip-aware tile / VMEM defaults: big tiles on v5e/v6e (128 MiB VMEM),
    # tighter budget on v7x (64 MiB physical, 2 TensorCores).
    if tile_bytes is None or vmem_limit_bytes is None:
        vmem_cap = 64 * 1024 * 1024
        try:
            info = pltpu.get_tpu_info()
            cap = getattr(info, "vmem_capacity_bytes", None)
            if cap:
                vmem_cap = int(cap)
        except Exception:
            pass
        if vmem_cap >= 96 * 1024 * 1024:        # v5e / v6e
            tb, vl = 4 << 20, 64 << 20
        else:                                   # v7x
            tb, vl = 2 << 20, 48 << 20
        tile_bytes = tile_bytes if tile_bytes is not None else tb
        vmem_limit_bytes = vmem_limit_bytes if vmem_limit_bytes is not None else vl

    # Rows per tile: multiple of 8 sublanes, targeting ~tile_bytes blocks.
    row_bytes = max(1, row_len * dsize)
    tr = max(8, ((tile_bytes // row_bytes) // 8) * 8)
    if r >= 16:
        # Guarantee >= 2 grid steps so v7x megacore can split the work.
        tr = min(tr, (((r + 1) // 2) + 7) // 8 * 8)
    tr = min(tr, ((r + 7) // 8) * 8)
    num_tiles = -(-r // tr)
    ragged_rows = (r % tr) != 0

    # Tiny resident weight table (2, H*W): lane-validity mask fused with the
    # 1/count scaling, computed once in the wrapper (not per element in-kernel).
    inv_cw = (1.0 / count_w) if count_w > 0 else 0.0
    inv_ch = (1.0 / count_h) if count_h > 0 else 0.0
    lane = jnp.arange(row_len, dtype=jnp.int32)
    ww = jnp.where(lane % w != w - 1, jnp.float32(inv_cw), jnp.float32(0.0))
    wh = jnp.where(lane < row_len - w, jnp.float32(inv_ch), jnp.float32(0.0))
    wts = jnp.stack([ww, wh], axis=0)

    kernel = functools.partial(_tv_kernel, img_w=w, rows_total=r, tile_rows=tr,
                               ragged_rows=ragged_rows)

    parts = pl.pallas_call(
        kernel,
        out_shape=jax.ShapeDtypeStruct((num_tiles, 8, 128), jnp.float32),
        grid_spec=pltpu.PrefetchScalarGridSpec(
            num_scalar_prefetch=0,
            grid=(num_tiles,),
            in_specs=[
                pl.BlockSpec((tr, row_len), lambda i: (i, 0)),
                pl.BlockSpec((2, row_len), lambda i: (0, 0)),   # resident
            ],
            out_specs=pl.BlockSpec((1, 8, 128), lambda i: (i, 0, 0)),
        ),
        compiler_params=pltpu.CompilerParams(
            dimension_semantics=("parallel",),
            vmem_limit_bytes=vmem_limit_bytes,
        ),
    )(x2, wts)

    total = jnp.sum(parts[:, 0, 0]) / b
    if count_h <= 0 or count_w <= 0:
        # Match PyTorch's 0/0 -> NaN for degenerate H == 1 or W == 1 inputs.
        total = total + jnp.float32(float("nan"))
    return total


def _reference_loss(x):
    # Pure-JAX reference matching the PyTorch forward exactly.
    b, c, h, w = x.shape
    count_h = (h - 1) * w
    count_w = h * (w - 1)
    h_tv = jnp.sum((x[:, :, 1:, :] - x[:, :, : h - 1, :]) ** 2)
    w_tv = jnp.sum((x[:, :, :, 1:] - x[:, :, :, : w - 1]) ** 2)
    return (h_tv / count_h + w_tv / count_w) / b


if __name__ == "__main__":
    key = jax.random.PRNGKey(0)
    x = jax.random.uniform(key, (2, 4, 16, 16), dtype=jnp.float32)

    loss = l_ill_loss(x)
    jax.block_until_ready(loss)

    ref = _reference_loss(x)
    assert jnp.allclose(loss, ref, rtol=1e-4, atol=1e-6), (loss, ref)
    print("KERNEL_OK")
</pallas_src>

<mosaic_0001>
module attributes {stable_mosaic.version = 11 : i64} {
  func.func @_tv_kernel(%arg0: i32, %arg1: memref<8x256xf32, #tpu.memory_space<vmem>>, %arg2: memref<2x256xf32, #tpu.memory_space<vmem>>, %arg3: memref<1x8x128xf32, #tpu.memory_space<vmem>>) attributes {dimension_semantics = [#tpu.dimension_semantics<parallel>], iteration_bounds = array<i64: 1>, scalar_prefetch = 0 : i64, scratch_operands = 0 : i64, tpu.core_type = #tpu.core_type<tc>, window_params = [{transform_indices = @transform_0, window_bounds = array<i64: 8, 256>}, {pipeline_mode = #tpu.pipeline_mode<synchronous>, transform_indices = @transform_1, window_bounds = array<i64: 2, 256>}, {transform_indices = @transform_2, window_bounds = array<i64: 1, 8, 128>}]} {
    %c0 = arith.constant 0 : index
    %c0_0 = arith.constant 0 : index
    %0 = vector.load %arg1[%c0, %c0_0] : memref<8x256xf32, #tpu.memory_space<vmem>>, vector<8x256xf32>
    %c0_1 = arith.constant 0 : index
    %c0_2 = arith.constant 0 : index
    %1 = vector.load %arg2[%c0_1, %c0_2] : memref<2x256xf32, #tpu.memory_space<vmem>>, vector<1x256xf32>
    %c1 = arith.constant 1 : index
    %c0_3 = arith.constant 0 : index
    %2 = vector.load %arg2[%c1, %c0_3] : memref<2x256xf32, #tpu.memory_space<vmem>>, vector<1x256xf32>
    %c255_i32 = arith.constant 255 : i32
    %3 = tpu.dynamic_rotate %0 by %c255_i32 dim 1 : vector<8x256xf32>, i32 -> vector<8x256xf32>
    %4 = arith.subf %3, %0 : vector<8x256xf32>
    %c240_i32 = arith.constant 240 : i32
    %5 = tpu.dynamic_rotate %0 by %c240_i32 dim 1 : vector<8x256xf32>, i32 -> vector<8x256xf32>
    %6 = arith.subf %5, %0 : vector<8x256xf32>
    %7 = arith.mulf %4, %4 : vector<8x256xf32>
    %8 = vector.broadcast %1 : vector<1x256xf32> to vector<8x256xf32>
    %9 = arith.mulf %7, %8 : vector<8x256xf32>
    %10 = arith.mulf %6, %6 : vector<8x256xf32>
    %11 = vector.broadcast %2 : vector<1x256xf32> to vector<8x256xf32>
    %12 = arith.mulf %10, %11 : vector<8x256xf32>
    %13 = arith.addf %9, %12 : vector<8x256xf32>
    %cst = arith.constant dense<0.000000e+00> : vector<8xf32>
    %14 = vector.multi_reduction <add>, %13, %cst [1] : vector<8x256xf32> to vector<8xf32>
    %15 = vector.shape_cast %14 : vector<8xf32> to vector<8x1xf32>
    %16 = vector.shape_cast %15 : vector<8x1xf32> to vector<1x8x1xf32>
    %cst_4 = arith.constant dense<0.000000e+00> : vector<1xf32>
    %17 = vector.multi_reduction <add>, %16, %cst_4 [1, 2] : vector<1x8x1xf32> to vector<1xf32>
    %18 = vector.shape_cast %17 : vector<1xf32> to vector<1x1x1xf32>
    %19 = vector.extract %18[0, 0, 0] : f32 from vector<1x1x1xf32>
    %20 = vector.broadcast %19 : f32 to vector<8x128xf32>
    %c0_5 = arith.constant 0 : index
    %c0_6 = arith.constant 0 : index
    %c0_7 = arith.constant 0 : index
    %21 = vector.load %arg3[%c0_5, %c0_6, %c0_7] : memref<1x8x128xf32, #tpu.memory_space<vmem>>, vector<1x8x128xf32>
    %22 = vector.shape_cast %21 : vector<1x8x128xf32> to vector<8x128xf32>
    %23 = vector.shape_cast %20 : vector<8x128xf32> to vector<1x8x128xf32>
    tpu.vector_store %arg3[%c0_5, %c0_6, %c0_7], %23 {strides = array<i32>} : memref<1x8x128xf32, #tpu.memory_space<vmem>>, vector<1x8x128xf32>,
    return
  }
  func.func @transform_0(%arg0: i32) -> (i32, i32) {
    %c0_i32 = arith.constant 0 : i32
    %c0_i32_0 = arith.constant 0 : i32
    return %arg0, %c0_i32 : i32, i32
  }
  func.func @transform_1(%arg0: i32) -> (i32, i32) {
    %c0_i32 = arith.constant 0 : i32
    %c0_i32_0 = arith.constant 0 : i32
    %c0_i32_1 = arith.constant 0 : i32
    return %c0_i32, %c0_i32_0 : i32, i32
  }
  func.func @transform_2(%arg0: i32) -> (i32, i32, i32) {
    %c0_i32 = arith.constant 0 : i32
    %c0_i32_0 = arith.constant 0 : i32
    %c0_i32_1 = arith.constant 0 : i32
    return %arg0, %c0_i32, %c0_i32_0 : i32, i32, i32
  }
}

</mosaic_0001>

<bundles_post_ra>
// kernel: tpu_custom_call.1
= control target key start
LH: loop header
LB: loop body
LE: loop exit
PB: predicated region body
PF: predicated region fallthrough
CT: control target
= control target key end

     0   :  { %7 = vsyncpa [#allocation3], 0  ;;  %s260_s0 = inlined_call_operand.hbm [shape: f32[8,256], index: 0, kind: input, shape index: {}]   ;;  %s261_s1 = inlined_call_operand.hbm [shape: f32[2,256], index: 1, kind: input, shape index: {}]   ;;  %s262_s2 = inlined_call_operand.hbm [shape: f32[1,8,128], index: 2, kind: output, shape index: {}]  }
   0x1   :  { %8 = vsyncpa [#allocation6], 0 }
   0x2   :  { %9 = vsyncpa [#allocation4], 0  ;;  %s204_s9 = smov [#allocation2]   ;;  %s205_s11 = smov [#allocation5]  }
   0x3   :  { %s16_s10 = sshll.u32 %s204_s9, 4  ;;  %s26_s12 = sshll.u32 %s205_s11, 4  ;;  %s17_s10 = int_to_ptr.vmem [resolvable:$true] %s16_s10  ;;  %s27_s12 = int_to_ptr.vmem [resolvable:$true] %s26_s12 }
   0x4   :  { %s132_s15 = scalar_lea.hbm %s260_s0, 256 }
   0x5   :  { %p133_p0 = scmp.ne.s32.totalorder %s260_s0, %s132_s15  ;;  %p136_p1 = scmp.lt.u32.totalorder %s132_s15, %s260_s0 }
   0x7   :  { %p138_p2 = pnand %p136_p1, %p133_p0 }
   0x9   :  { %141 = shalt.err (!%p138_p2)
}
   0xa   :  { %s142_s20 = scalar_lea.vmem %s17_s10, 256  ;;  %p147_p4 = scmp.lt.s32.totalorder %s17_s10, %s17_s10 }
   0xb   :  { %p143_p3 = scmp.ne.s32.totalorder %s17_s10, %s142_s20  ;;  %p148_p5 = scmp.lt.s32.totalorder %s142_s20, %s142_s20 }
   0xd   :  { %p149_p6 = por %p148_p5, %p147_p4 }
   0xf   :  { %p150_p7 = pnand %p149_p6, %p143_p3 }
  0x11   :  { %153 = shalt.err (!%p150_p7)
}
  0x12   :  { %19 = dma.hbm_to_vmem [thread:$0]  %s260_s0, 256, %s17_s10, [#allocation3]  }
  0x13   :  { %s154_s25 = scalar_lea.hbm %s261_s1, 64 }
  0x14   :  { %p155_p8 = scmp.ne.s32.totalorder %s261_s1, %s154_s25  ;;  %p158_p9 = scmp.lt.u32.totalorder %s154_s25, %s261_s1 }
  0x16   :  { %p160_p10 = pnand %p158_p9, %p155_p8 }
  0x18   :  { %163 = shalt.err (!%p160_p10)
}
  0x19   :  { %s164_s30 = scalar_lea.vmem %s27_s12, 64  ;;  %p169_p12 = scmp.lt.s32.totalorder %s27_s12, %s27_s12 }
  0x1a   :  { %p165_p11 = scmp.ne.s32.totalorder %s27_s12, %s164_s30  ;;  %p170_p13 = scmp.lt.s32.totalorder %s164_s30, %s164_s30 }
  0x1c   :  { %p171_p0 = por %p170_p13, %p169_p12 }
  0x1e   :  { %p172_p1 = pnand %p171_p0, %p165_p11 }
  0x20   :  { %175 = shalt.err (!%p172_p1)
}
  0x21   :  { %29 = dma.hbm_to_vmem [thread:$0]  %s261_s1, 64, %s27_s12, [#allocation6]  }
  0x22   :  { %198 = dma.done.wait [#allocation3], 256  }
  0x23   :  { %199 = vsyncadd [#allocation3], 4294967040 }
  0x24   :  { %200 = dma.done.wait [#allocation6], 64  }
  0x25   :  { %201 = vsyncadd [#allocation6], 4294967232  ;;  %v36_v0 = vld [vmem:[#allocation2] sm:$0xff]  ;;  %s206_s4 = smov 112   ;;  %s207_s5 = smov 127   ;;  %v37_v1 = vld [vmem:[#allocation2 + $0x8] sm:$0xff]  ;;  %v45_v2 = vlaneseq }
  0x26   :  { %52 = vrot.lane.b32.xlu1 %v36_v0, %s206_s4  ;;  %41 = vrot.lane.b32.xlu0 %v36_v0, %s207_s5  ;;  %v40_v9 = vld [vmem:[#allocation5 + $0x1] ss:$2 sm:$0x3]  ;;  %v38_v10 = vld [vmem:[#allocation5] ss:$2 sm:$0x3] }
  0x27   :  { %v65_v3 = vshrl.u32 %v45_v2, 7  ;;  %v46_v4 = vand.u32 127, %v45_v2  ;;  %vm96_vm2 = vcmask 7168   ;;  %s208_s1 = smov [#allocation7]  }
  0x28   :  { %s115_s6 = sshll.u32 %s208_s1, 4  ;;  %s116_s6 = int_to_ptr.vmem [resolvable:$true] %s115_s6 }
  0x29   :  { %v66_v7 = vsub.s32 0, %v65_v3  ;;  %v70_v8 = vsub.s32 1, %v65_v3  ;;  %vm56_vm0 = vcmp.lt.s32.totalorder %v46_v4, 112  ;;  %vm47_vm1 = vcmp.lt.s32.totalorder %v46_v4, 127  ;;  %s176_s8 = scalar_lea.vmem %s116_s6, 128  ;;  %p181_p3 = scmp.lt.s32.totalorder %s116_s6, %s116_s6 }
  0x2a   :  { %54 = vrot.lane.b32.xlu1 %v37_v1, %s206_s4  ;;  %43 = vrot.lane.b32.xlu0 %v37_v1, %s207_s5  ;;  %p177_p2 = scmp.ne.s32.totalorder %s116_s6, %s176_s8  ;;  %p182_p4 = scmp.lt.s32.totalorder %s176_s8, %s176_s8 }
  0x2b   :  { %v82_v11 = vrot.slane %v40_v9, %v66_v7  ;;  %v86_v12 = vrot.slane %v40_v9, %v70_v8  ;;  %v67_v14 = vrot.slane %v38_v10, %v66_v7  ;;  %v71_v15 = vrot.slane %v38_v10, %v70_v8 }
  0x2c   :  { %p183_p5 = por %p182_p4, %p181_p3 }
  0x2e   :  { %p184_p6 = pnand %p183_p5, %p177_p2 }
  0x98   :  { %v53_v5 = vpop.permute.xlu1 %52  ;;  %v42_v6 = vpop.permute.xlu0 %41 }
  0x9c   :  { %v55_v13 = vpop.permute.xlu1 %54  ;;  %v44_v16 = vpop.permute.xlu0 %43 }
  0x9d   :  { %v57_v17 = vsel %vm56_vm0, %v53_v5, %v55_v13  ;;  %v58_v18 = vsel %vm56_vm0, %v55_v13, %v53_v5  ;;  %v48_v19 = vsel %vm47_vm1, %v42_v6, %v44_v16  ;;  %v49_v20 = vsel %vm47_vm1, %v44_v16, %v42_v6 }
  0x9e   :  { %v59_v21 = vsub.f32 %v57_v17, %v36_v0  ;;  %v60_v22 = vsub.f32 %v58_v18, %v37_v1  ;;  %v50_v23 = vsub.f32 %v48_v19, %v36_v0  ;;  %v51_v24 = vsub.f32 %v49_v20, %v37_v1 }
  0xa0   :  { %v76_v25 = vmul.f32 %v59_v21, %v59_v21  ;;  %v77_v26 = vmul.f32 %v60_v22, %v60_v22  ;;  %v61_v27 = vmul.f32 %v50_v23, %v50_v23  ;;  %v62_v28 = vmul.f32 %v51_v24, %v51_v24 }
  0xa2   :  { %v89_v29 = vmul.f32 %v82_v11, %v76_v25  ;;  %v90_v30 = vmul.f32 %v86_v12, %v77_v26  ;;  %v74_v31 = vmul.f32 %v67_v14, %v61_v27  ;;  %v75_v32 = vmul.f32 %v71_v15, %v62_v28 }
  0xa4   :  { %v91_v33 = vadd.f32 %v89_v29, %v74_v31  ;;  %v92_v34 = vadd.f32 %v90_v30, %v75_v32 }
  0xa6   :  { %v93_v35 = vadd.f32 %v92_v34, %v91_v33 }
  0xa8   :  { %94 = vadd.xlane.f32.xlu0 %v93_v35 }
 0x135   :  { %v95_v36 = vpop.xlane.xlu0 %94 }
 0x136   :  { %v97_v37 = vsel %vm96_vm2, %v95_v36, 0.0 }
 0x137   :  { %98 = vadd.xlane.f32.xlu1 %v97_v37 }
 0x1c4   :  { %v99_v38 = vpop.xlane.xlu1 %98 }
 0x1c5   :  { %v100_v39 = vrot.slane %v99_v38, 4 }
 0x1c7   :  { %v101_v40 = vadd.f32 %v100_v39, %v99_v38 }
 0x1c9   :  { %v102_v41 = vrot.slane %v101_v40, 2 }
 0x1cb   :  { %v103_v42 = vadd.f32 %v102_v41, %v101_v40 }
 0x1cd   :  { %v104_v43 = vrot.slane %v103_v42, 1 }
 0x1cf   :  { %v105_v44 = vadd.f32 %v104_v43, %v103_v42 }
 0x1d1   :  { %125 = vpush %v105_v44 }
 0x202   :  { %s126_s7 = spop %125 }
 0x203   :  { %v107_v45 = vstv %s126_s7 }
 0x204   :  { %108 = vst [vmem:[#allocation7] sm:$0xff] %v107_v45 }
 0x205   :  { %187 = shalt.err (!%p184_p6)
}
 0x206   :  { %s188_s11 = scalar_lea.hbm %s262_s2, 128 }
 0x207   :  { %p189_p7 = scmp.ne.s32.totalorder %s262_s2, %s188_s11  ;;  %p192_p8 = scmp.lt.u32.totalorder %s188_s11, %s262_s2 }
 0x209   :  { %p194_p9 = pnand %p192_p8, %p189_p7 }
 0x20b   :  { %197 = shalt.err (!%p194_p9)
}
 0x20c   :  { %118 = dma.vmem_to_hbm [thread:$0]  %s116_s6, 128, %s262_s2, [#allocation4]  }
 0x20d   :  { %202 = dma.done.wait [#allocation4], 128  }
 0x20e   :  { %203 = vsyncadd [#allocation4], 4294967168 }
 0x20f   :  { %122 = vsyncpa [#allocation3], 1 }
 0x210   :  { %123 = vsyncpa [#allocation6], 1 }
 0x211   :  { %124 = vsyncpa [#allocation4], 1 }

</bundles_post_ra>
